<compile_context>
chip_gen: v7x
topology: tpu7x:2x2x1
jax: 0.10.0
libtpu: 0.0.40
codegen_flags: <defaults>
</compile_context>

<pallas_src>
import jax
import jax.numpy as jnp
from jax.experimental import pallas as pl
from jax.experimental.pallas import tpu as pltpu

_MIB = 1024 * 1024
_LANE_WIDTHS = (4096, 2048, 1024, 512, 256, 128)


def _add1_mul2_kernel(x_ref, o_ref):
    # (x + 1) * 2 ; Python-int literals keep the input dtype (weak typing),
    # so the same kernel works for f32 / bf16 / int inputs.
    o_ref[...] = (x_ref[0] + 1) * 2


def _device_block_budget():
    """(target block bytes, vmem_limit_bytes) tuned per TPU generation."""
    try:
        vmem_cap = pltpu.get_tpu_info().vmem_capacity_bytes
    except Exception:
        vmem_cap = 128 * _MIB  # assume v5e/v6e-class if the query is unavailable
    if vmem_cap <= 64 * _MIB:
        # v7x-class: per-grid-step overhead is a larger fraction of DMA time at
        # 3.2 TB/s, so use 4 MiB blocks.  2 bufs in + 2 bufs out = 16 MiB.
        return 4 * _MIB, 32 * _MIB
    # v5e / v6e: 2 MiB blocks are already at the HBM-roofline plateau and the
    # double-buffered budget (8 MiB) fits v5e's 16 MiB scoped-VMEM default.
    return 2 * _MIB, None


def _row_tiling(R, C, dtype):
    """Pick a row-block size (multiple of the dtype's min sublane count)."""
    itemsize = jnp.dtype(dtype).itemsize
    min_sub = max(8, 32 // itemsize)        # 8 (f32) / 16 (bf16) / 32 (i8,fp8)
    target_bytes, vmem_limit = _device_block_budget()
    row_bytes = C * itemsize
    tr = max(min_sub, target_bytes // row_bytes)
    tr -= tr % min_sub
    slab_bytes = R * row_bytes
    if tr >= R:
        if R >= 2 * min_sub and slab_bytes > 2 * _MIB:
            # Split into >=2 row blocks so the "parallel" axis can actually be
            # sharded across both TensorCores on v7x (no effect on v5e/v6e).
            tr = (((R + 1) // 2) + min_sub - 1) // min_sub * min_sub
        else:
            tr = R                           # single full-extent block
    grid_len = pl.cdiv(R, tr)
    return tr, grid_len, vmem_limit


def _per_batch_call(x3d, b, tr, grid_len, vmem_limit):
    """Run (x+1)*2 over batch slice b of x3d, writing its own output buffer."""
    _, R, C = x3d.shape
    itemsize = jnp.dtype(x3d.dtype).itemsize
    n = R * C
    cost = pl.CostEstimate(
        flops=2 * n,
        transcendentals=0,
        bytes_accessed=2 * n * itemsize,
    )
    return pl.pallas_call(
        _add1_mul2_kernel,
        out_shape=jax.ShapeDtypeStruct((R, C), x3d.dtype),
        grid=(grid_len,),
        # The batch slice is selected by the index_map -> no x[i] copy.
        in_specs=[pl.BlockSpec((1, tr, C), lambda r, b=b: (b, r, 0))],
        out_specs=pl.BlockSpec((tr, C), lambda r: (r, 0)),
        compiler_params=pltpu.CompilerParams(
            dimension_semantics=("parallel",),
            vmem_limit_bytes=vmem_limit,
        ),
        cost_estimate=cost,
    )(x3d)


@jax.jit
def pt_module_forward(x):
    """Mirrors PtModule.forward: returns a list of (x[i] + 1) * 2 tensors."""
    B = x.shape[0]
    n = 1
    for d in x.shape[1:]:
        n *= d

    width = next((w for w in _LANE_WIDTHS if n % w == 0), None)
    if width is None:
        # TODO(synk): per-sample sizes that are not a multiple of 128 fall back
        # to a fused XLA elementwise op (cheaper than a pad + slice HBM pass).
        return [(x[i] + 1) * 2 for i in range(B)]

    # Contiguous reshape -> bitcast under jit (no data movement).
    x3d = x.reshape(B, n // width, width)
    R, C = x3d.shape[1], x3d.shape[2]
    tr, grid_len, vmem_limit = _row_tiling(R, C, x.dtype)

    outs = []
    for b in range(B):
        y2d = _per_batch_call(x3d, b, tr, grid_len, vmem_limit)
        outs.append(y2d.reshape(x.shape[1:]))
    return outs


if __name__ == "__main__":
    key = jax.random.PRNGKey(0)
    x = jax.random.normal(key, (2, 4, 16, 16), dtype=jnp.float32)

    out = pt_module_forward(x)
    out = [jax.block_until_ready(o) for o in out]

    # Quick correctness check against the reference semantics.
    ref = [(x[i] + 1.0) * 2.0 for i in range(x.shape[0])]
    for o, r in zip(out, ref):
        assert o.shape == r.shape
        assert jnp.max(jnp.abs(o - r)) < 1e-6

    print("KERNEL_OK")
</pallas_src>

<mosaic_0001>
module attributes {stable_mosaic.version = 11 : i64} {
  func.func @_add1_mul2_kernel(%arg0: i32, %arg1: memref<1x1x1024xf32, #tpu.memory_space<vmem>>, %arg2: memref<1x1024xf32, #tpu.memory_space<vmem>>) attributes {dimension_semantics = [#tpu.dimension_semantics<parallel>], iteration_bounds = array<i64: 1>, scalar_prefetch = 0 : i64, scratch_operands = 0 : i64, tpu.core_type = #tpu.core_type<tc>, window_params = [{transform_indices = @transform_0, window_bounds = array<i64: 1, 1, 1024>}, {transform_indices = @transform_1, window_bounds = array<i64: 1, 1024>}]} {
    %c0 = arith.constant 0 : index
    %c0_0 = arith.constant 0 : index
    %c0_1 = arith.constant 0 : index
    %0 = vector.load %arg1[%c0, %c0_0, %c0_1] : memref<1x1x1024xf32, #tpu.memory_space<vmem>>, vector<1x1x1024xf32>
    %1 = vector.shape_cast %0 : vector<1x1x1024xf32> to vector<1x1024xf32>
    %cst = arith.constant 1.000000e+00 : f32
    %2 = vector.broadcast %cst : f32 to vector<1x1024xf32>
    %3 = arith.addf %1, %2 : vector<1x1024xf32>
    %cst_2 = arith.constant 2.000000e+00 : f32
    %4 = vector.broadcast %cst_2 : f32 to vector<1x1024xf32>
    %5 = arith.mulf %3, %4 : vector<1x1024xf32>
    %c0_3 = arith.constant 0 : index
    %c0_4 = arith.constant 0 : index
    %6 = vector.load %arg2[%c0_3, %c0_4] : memref<1x1024xf32, #tpu.memory_space<vmem>>, vector<1x1024xf32>
    tpu.vector_store %arg2[%c0_3, %c0_4], %5 {strides = array<i32>} : memref<1x1024xf32, #tpu.memory_space<vmem>>, vector<1x1024xf32>,
    return
  }
  func.func @transform_0(%arg0: i32) -> (i32, i32, i32) {
    %c0_i32 = arith.constant 0 : i32
    %c0_i32_0 = arith.constant 0 : i32
    %c0_i32_1 = arith.constant 0 : i32
    return %c0_i32, %arg0, %c0_i32_0 : i32, i32, i32
  }
  func.func @transform_1(%arg0: i32) -> (i32, i32) {
    %c0_i32 = arith.constant 0 : i32
    %c0_i32_0 = arith.constant 0 : i32
    return %arg0, %c0_i32 : i32, i32
  }
}

module attributes {stable_mosaic.version = 11 : i64} {
  func.func @_add1_mul2_kernel(%arg0: i32, %arg1: memref<1x1x1024xf32, #tpu.memory_space<vmem>>, %arg2: memref<1x1024xf32, #tpu.memory_space<vmem>>) attributes {dimension_semantics = [#tpu.dimension_semantics<parallel>], iteration_bounds = array<i64: 1>, scalar_prefetch = 0 : i64, scratch_operands = 0 : i64, tpu.core_type = #tpu.core_type<tc>, window_params = [{transform_indices = @transform_0, window_bounds = array<i64: 1, 1, 1024>}, {transform_indices = @transform_1, window_bounds = array<i64: 1, 1024>}]} {
    %c0 = arith.constant 0 : index
    %c0_0 = arith.constant 0 : index
    %c0_1 = arith.constant 0 : index
    %0 = vector.load %arg1[%c0, %c0_0, %c0_1] : memref<1x1x1024xf32, #tpu.memory_space<vmem>>, vector<1x1x1024xf32>
    %1 = vector.shape_cast %0 : vector<1x1x1024xf32> to vector<1x1024xf32>
    %cst = arith.constant 1.000000e+00 : f32
    %2 = vector.broadcast %cst : f32 to vector<1x1024xf32>
    %3 = arith.addf %1, %2 : vector<1x1024xf32>
    %cst_2 = arith.constant 2.000000e+00 : f32
    %4 = vector.broadcast %cst_2 : f32 to vector<1x1024xf32>
    %5 = arith.mulf %3, %4 : vector<1x1024xf32>
    %c0_3 = arith.constant 0 : index
    %c0_4 = arith.constant 0 : index
    %6 = vector.load %arg2[%c0_3, %c0_4] : memref<1x1024xf32, #tpu.memory_space<vmem>>, vector<1x1024xf32>
    tpu.vector_store %arg2[%c0_3, %c0_4], %5 {strides = array<i32>} : memref<1x1024xf32, #tpu.memory_space<vmem>>, vector<1x1024xf32>,
    return
  }
  func.func @transform_0(%arg0: i32) -> (i32, i32, i32) {
    %c1_i32 = arith.constant 1 : i32
    %c0_i32 = arith.constant 0 : i32
    %c0_i32_0 = arith.constant 0 : i32
    return %c1_i32, %arg0, %c0_i32 : i32, i32, i32
  }
  func.func @transform_1(%arg0: i32) -> (i32, i32) {
    %c0_i32 = arith.constant 0 : i32
    %c0_i32_0 = arith.constant 0 : i32
    return %arg0, %c0_i32 : i32, i32
  }
}

</mosaic_0001>

<bundles_post_ra>
// kernel: pt_module_forward.3
= control target key start
LH: loop header
LB: loop body
LE: loop exit
PB: predicated region body
PF: predicated region fallthrough
CT: control target
= control target key end

     0   :  { %s36_s0 = inlined_call_operand.vmem [shape: f32[2,1,1024], index: 0, kind: input, shape index: {}]   ;;  %s37_s1 = inlined_call_operand.vmem [shape: f32[1,1024], index: 1, kind: output, shape index: {}]  }
   0x1   :  { %v19_v0 = vld [vmem:[%s36_s0 + $0x8] sm:$0xff] }
   0x2   :  { %v12_v1 = vadd.f32 1.0, %v19_v0 }
   0x4   :  { %v13_v2 = vmul.f32 2.0, %v12_v1 }
   0x6   :  { %14 = vst [vmem:[%s37_s1] sm:$0xff] %v13_v2 }

// kernel: pt_module_forward.2
= control target key start
LH: loop header
LB: loop body
LE: loop exit
PB: predicated region body
PF: predicated region fallthrough
CT: control target
= control target key end

     0   :  { %s32_s0 = inlined_call_operand.vmem [shape: f32[2,1,1024], index: 0, kind: input, shape index: {}]   ;;  %s33_s1 = inlined_call_operand.vmem [shape: f32[1,1024], index: 1, kind: output, shape index: {}]  }
   0x1   :  { %v8_v0 = vld [vmem:[%s32_s0] sm:$0xff] }
   0x2   :  { %v9_v1 = vadd.f32 1.0, %v8_v0 }
   0x4   :  { %v10_v2 = vmul.f32 2.0, %v9_v1 }
   0x6   :  { %11 = vst [vmem:[%s33_s1] sm:$0xff] %v10_v2 }

</bundles_post_ra>
